<compile_context>
chip_gen: v7x
topology: tpu7x:2x2x1
jax: 0.10.0
libtpu: 0.0.40
codegen_flags: <defaults>
</compile_context>

<pallas_src>
import functools

import jax
import jax.numpy as jnp
import numpy as np
from jax.experimental import pallas as pl
from jax.experimental.pallas import tpu as pltpu


def _round_up(a, b):
    return -(-a // b) * b


def _basic_conv_kernel(*refs, taps, F, relu, has_bias):
    """One (sample, row-tile) block.

    refs: x_ref (1, 1, P, C, Lblk), w_ref (KH*KW, O, C), [b_ref (O, 1)],
          o_ref (1, O, F).
    Each tap slices a (C, F) slab straight off the Ref at a static lane
    offset and feeds one MXU matmul; partial products accumulate in a single
    f32 accumulator.  No im2col materialization, reshape or concatenate.
    """
    if has_bias:
        x_ref, w_ref, b_ref, o_ref = refs
    else:
        x_ref, w_ref, o_ref = refs
        b_ref = None

    acc = None
    for ti, (p, off) in enumerate(taps):
        slab = x_ref[0, 0, p, :, pl.ds(off, F)]               # (C, F)
        part = jnp.dot(w_ref[ti], slab,
                       preferred_element_type=jnp.float32)    # (O, F), f32
        acc = part if acc is None else acc + part

    if has_bias:
        acc = acc + b_ref[...]                                 # (O, 1) bcast
    if relu:
        acc = jnp.maximum(acc, 0.0)
    o_ref[0] = acc.astype(o_ref.dtype)                         # lane-dense store


def basic_conv(x, weight, bias=None, *, stride=1, padding=0, dilation=1,
               groups=1, relu=True, row_tile=None, compute_dtype=None):
    """Forward pass of BasicConv.  x: (N, C, H, W) NCHW, weight: (O, C, KH, KW)."""
    assert groups == 1, "groups != 1 not supported in this kernel"
    N, C, H, W = x.shape
    O, Cw, KH, KW = weight.shape
    assert Cw == C
    s, d, p = int(stride), int(dilation), int(padding)

    HO = (H + 2 * p - d * (KH - 1) - 1) // s + 1
    WO = (W + 2 * p - d * (KW - 1) - 1) // s + 1
    assert HO > 0 and WO > 0

    # Stride folded into s*s phase images -> every tap offset is static and
    # unit-stride inside the kernel.
    P = s * s
    r_max = ((KH - 1) * d) // s
    c_max = ((KW - 1) * d) // s
    # Flat row width of a phase image (valid output columns never wrap;
    # junk columns [WO, Wps) are stripped in the wrapper).
    Wps = max(WO + c_max, -(-(W + p) // s))

    out_dtype = x.dtype
    isz = jnp.dtype(compute_dtype).itemsize if compute_dtype is not None \
        else jnp.dtype(x.dtype).itemsize
    osz = jnp.dtype(out_dtype).itemsize

    # Generation-aware VMEM budget (v5e/v6e: 128 MiB physical, v7x: 64 MiB).
    try:
        cap = int(pltpu.get_tpu_info().vmem_capacity_bytes)
    except Exception:
        cap = 64 * 1024 * 1024
    budget = max(32 * 1024 * 1024, int(0.75 * cap))

    def geometry(th):
        tw = th * Wps
        F = _round_up(tw, 128)                       # lane-dense output width
        Lb = r_max * Wps + c_max + F                 # haloed per-tile flat len
        Lp = _round_up((HO - th) * Wps + Lb, Wps)    # full phase-image flat len
        return tw, F, Lb, Lp

    def vmem_est(th):
        tw, F, Lb, Lp = geometry(th)
        T = HO // th
        in_blk = P * C * (Lp if T == 1 else Lb) * isz
        out_blk = O * F * osz
        w_blk = KH * KW * O * C * isz
        b_blk = O * 4 if bias is not None else 0
        temps = O * F * 4 + C * F * isz              # accumulator + one slab
        return 2 * (in_blk + out_blk + w_blk + b_blk) + temps + (1 << 20)

    divisors = [dd for dd in range(1, HO + 1) if HO % dd == 0]
    if row_tile is not None:
        assert HO % row_tile == 0, "row_tile must divide HO"
        th = int(row_tile)
    else:
        # Smallest row tile giving >= 1024 output lanes per matmul, shrunk if
        # the double-buffered blocks would not fit the VMEM budget.
        th = HO
        for cand in divisors:
            if cand * Wps >= 1024:
                th = cand
                break
        while vmem_est(th) > budget:
            smaller = [dd for dd in divisors if dd < th]
            if not smaller:
                break
            th = smaller[-1]
    T = HO // th
    tw, F, Lb, Lp = geometry(th)
    Hps = max(Lp // Wps, -(-(H + p) // s))
    Lp = Hps * Wps

    # Single zero pad (conv padding + flat/phase alignment); layout stays NCHW.
    x_pad = jnp.pad(x, ((0, 0), (0, 0),
                        (p, Hps * s - H - p), (p, Wps * s - W - p)))
    if compute_dtype is not None:
        x_pad = x_pad.astype(compute_dtype)
        weight = weight.astype(compute_dtype)

    if s > 1:
        xr = x_pad.reshape(N, C, Hps, s, Wps, s)
        x_flat = jnp.transpose(xr, (0, 3, 5, 1, 2, 4)).reshape(N, P, C, Hps * Wps)
    else:
        x_flat = x_pad.reshape(N, 1, C, Hps * Wps)   # free reshape, no transpose

    if T == 1:
        x_in = x_flat.reshape(N, 1, P, C, Lp)
        Lblk = Lp
    else:
        # Haloed row tiles (duplicated once in the wrapper) so every kernel
        # input block is a small, independent, double-buffered VMEM tile.
        idx = (np.arange(T, dtype=np.int32)[:, None] * tw
               + np.arange(Lb, dtype=np.int32)[None, :])
        x_in = jnp.moveaxis(x_flat[:, :, :, idx], 3, 1)      # (N, T, P, C, Lb)
        Lblk = Lb

    # Static per-tap (phase index, flat offset) pairs.
    taps = []
    for kh in range(KH):
        for kw in range(KW):
            oh, ow = kh * d, kw * d
            taps.append(((oh % s) * s + (ow % s), (oh // s) * Wps + ow // s))
    taps = tuple(taps)

    # (O, C, KH, KW) -> (KH*KW, O, C); w_taps[kh*KW+kw] == weight[:, :, kh, kw].
    w_taps = jnp.transpose(weight, (2, 3, 0, 1)).reshape(KH * KW, O, C)

    has_bias = bias is not None
    inputs = [x_in, w_taps]
    in_specs = [
        pl.BlockSpec((1, 1, P, C, Lblk), lambda n, t: (n, t, 0, 0, 0)),
        pl.BlockSpec((KH * KW, O, C), lambda n, t: (0, 0, 0)),
    ]
    if has_bias:
        inputs.append(jnp.asarray(bias, jnp.float32).reshape(O, 1))
        in_specs.append(pl.BlockSpec((O, 1), lambda n, t: (0, 0)))

    kernel = functools.partial(_basic_conv_kernel, taps=taps, F=F,
                               relu=relu, has_bias=has_bias)

    out = pl.pallas_call(
        kernel,
        out_shape=jax.ShapeDtypeStruct((N, O, T * F), out_dtype),
        grid=(N, T),
        in_specs=in_specs,
        out_specs=pl.BlockSpec((1, O, F), lambda n, t: (n, 0, t)),
        compiler_params=pltpu.CompilerParams(
            dimension_semantics=("parallel", "parallel"),
            vmem_limit_bytes=int(budget)),
    )(*inputs)

    # Strip lane padding / junk columns; all reshapes are contiguous (cheap).
    out = out.reshape(N, O, T, F)[..., :tw]
    out = out.reshape(N, O, T, th, Wps).reshape(N, O, HO, Wps)
    return out[..., :WO]


if __name__ == "__main__":
    key = jax.random.PRNGKey(0)
    kx, kw, kb = jax.random.split(key, 3)

    # BasicConv(in_planes=4, out_planes=8, kernel_size=3, stride=1, padding=1)
    N, C, H, W = 2, 4, 16, 16
    O, KH, KW = 8, 3, 3
    x = jax.random.normal(kx, (N, C, H, W), dtype=jnp.float32)
    fan_in = C * KH * KW
    weight = jax.random.normal(kw, (O, C, KH, KW), jnp.float32) * (2.0 / fan_in) ** 0.5
    bias_vec = jax.random.normal(kb, (O,), jnp.float32)

    def ref_conv(x, w, b, stride, padding, relu=True):
        out = jax.lax.conv_general_dilated(
            x, w, window_strides=(stride, stride),
            padding=((padding, padding), (padding, padding)),
            dimension_numbers=("NCHW", "OIHW", "NCHW"))
        if b is not None:
            out = out + b[None, :, None, None]
        return jnp.maximum(out, 0.0) if relu else out

    def check(out, ref, tol, name):
        out = jax.block_until_ready(out)
        assert out.shape == ref.shape, (name, out.shape, ref.shape)
        err = float(jnp.max(jnp.abs(out - ref)))
        assert err <= tol, (name, err)

    # 1) Default tiling (single row tile), stride=1, padding=1, bias=False.
    ref1 = ref_conv(x, weight, None, 1, 1)
    check(basic_conv(x, weight, stride=1, padding=1), ref1, 2e-4, "default")

    # 2) Multi-row-tile path (T=4, 128-lane output blocks, haloed input tiles).
    check(basic_conv(x, weight, stride=1, padding=1, row_tile=4),
          ref1, 2e-4, "tiled")

    # 3) Bias path.
    ref3 = ref_conv(x, weight, bias_vec, 1, 1)
    check(basic_conv(x, weight, bias_vec, stride=1, padding=1),
          ref3, 2e-4, "bias")

    # 4) Strided conv (stride folded into 4 phase images in the wrapper).
    ref4 = ref_conv(x, weight, None, 2, 1)
    check(basic_conv(x, weight, stride=2, padding=1), ref4, 2e-4, "stride2")

    # 5) bf16 matmul inputs / f32 accumulation (recommended on v6e/v7x).
    check(basic_conv(x, weight, stride=1, padding=1,
                     compute_dtype=jnp.bfloat16), ref1, 1e-1, "bf16")

    print("KERNEL_OK")
</pallas_src>

<mosaic_0001>
module attributes {stable_mosaic.version = 11 : i64} {
  func.func @_basic_conv_kernel(%arg0: i32, %arg1: i32, %arg2: memref<1x1x1x4x432xf32, #tpu.memory_space<vmem>>, %arg3: memref<9x8x4xf32, #tpu.memory_space<vmem>>, %arg4: memref<1x8x384xf32, #tpu.memory_space<vmem>>) attributes {dimension_semantics = [#tpu.dimension_semantics<parallel>, #tpu.dimension_semantics<parallel>], iteration_bounds = array<i64: 2, 1>, scalar_prefetch = 0 : i64, scratch_operands = 0 : i64, tpu.core_type = #tpu.core_type<tc>, window_params = [{transform_indices = @transform_0, window_bounds = array<i64: 1, 1, 1, 4, 432>}, {pipeline_mode = #tpu.pipeline_mode<synchronous>, transform_indices = @transform_1, window_bounds = array<i64: 9, 8, 4>}, {transform_indices = @transform_2, window_bounds = array<i64: 1, 8, 384>}]} {
    %c0 = arith.constant 0 : index
    %c0_0 = arith.constant 0 : index
    %c0_1 = arith.constant 0 : index
    %c0_2 = arith.constant 0 : index
    %c0_3 = arith.constant 0 : index
    %0 = vector.load %arg2[%c0, %c0_0, %c0_1, %c0_2, %c0_3] : memref<1x1x1x4x432xf32, #tpu.memory_space<vmem>>, vector<1x1x1x4x384xf32>
    %1 = vector.shape_cast %0 : vector<1x1x1x4x384xf32> to vector<4x384xf32>
    %c0_4 = arith.constant 0 : index
    %c0_5 = arith.constant 0 : index
    %c0_6 = arith.constant 0 : index
    %2 = vector.load %arg3[%c0_4, %c0_5, %c0_6] : memref<9x8x4xf32, #tpu.memory_space<vmem>>, vector<1x8x4xf32>
    %3 = vector.shape_cast %2 : vector<1x8x4xf32> to vector<8x4xf32>
    %cst = arith.constant dense<0.000000e+00> : vector<8x384xf32>
    %4 = tpu.matmul %3, %1, %cst {dimension_numbers = #tpu.dot_dimension_numbers<[1], [0], [0], [1], [0, 0, 1, 1], [], []>} : vector<8x4xf32>, vector<4x384xf32>, vector<8x384xf32> -> vector<8x384xf32>
    %c0_7 = arith.constant 0 : index
    %c0_8 = arith.constant 0 : index
    %c0_9 = arith.constant 0 : index
    %c0_10 = arith.constant 0 : index
    %c1 = arith.constant 1 : index
    %5 = vector.load %arg2[%c0_7, %c0_8, %c0_9, %c0_10, %c1] : memref<1x1x1x4x432xf32, #tpu.memory_space<vmem>>, vector<1x1x1x4x384xf32>
    %6 = vector.shape_cast %5 : vector<1x1x1x4x384xf32> to vector<4x384xf32>
    %c1_11 = arith.constant 1 : index
    %c0_12 = arith.constant 0 : index
    %c0_13 = arith.constant 0 : index
    %7 = vector.load %arg3[%c1_11, %c0_12, %c0_13] : memref<9x8x4xf32, #tpu.memory_space<vmem>>, vector<1x8x4xf32>
    %8 = vector.shape_cast %7 : vector<1x8x4xf32> to vector<8x4xf32>
    %cst_14 = arith.constant dense<0.000000e+00> : vector<8x384xf32>
    %9 = tpu.matmul %8, %6, %cst_14 {dimension_numbers = #tpu.dot_dimension_numbers<[1], [0], [0], [1], [0, 0, 1, 1], [], []>} : vector<8x4xf32>, vector<4x384xf32>, vector<8x384xf32> -> vector<8x384xf32>
    %10 = arith.addf %4, %9 : vector<8x384xf32>
    %c0_15 = arith.constant 0 : index
    %c0_16 = arith.constant 0 : index
    %c0_17 = arith.constant 0 : index
    %c0_18 = arith.constant 0 : index
    %c2 = arith.constant 2 : index
    %11 = vector.load %arg2[%c0_15, %c0_16, %c0_17, %c0_18, %c2] : memref<1x1x1x4x432xf32, #tpu.memory_space<vmem>>, vector<1x1x1x4x384xf32>
    %12 = vector.shape_cast %11 : vector<1x1x1x4x384xf32> to vector<4x384xf32>
    %c2_19 = arith.constant 2 : index
    %c0_20 = arith.constant 0 : index
    %c0_21 = arith.constant 0 : index
    %13 = vector.load %arg3[%c2_19, %c0_20, %c0_21] : memref<9x8x4xf32, #tpu.memory_space<vmem>>, vector<1x8x4xf32>
    %14 = vector.shape_cast %13 : vector<1x8x4xf32> to vector<8x4xf32>
    %cst_22 = arith.constant dense<0.000000e+00> : vector<8x384xf32>
    %15 = tpu.matmul %14, %12, %cst_22 {dimension_numbers = #tpu.dot_dimension_numbers<[1], [0], [0], [1], [0, 0, 1, 1], [], []>} : vector<8x4xf32>, vector<4x384xf32>, vector<8x384xf32> -> vector<8x384xf32>
    %16 = arith.addf %10, %15 : vector<8x384xf32>
    %c0_23 = arith.constant 0 : index
    %c0_24 = arith.constant 0 : index
    %c0_25 = arith.constant 0 : index
    %c0_26 = arith.constant 0 : index
    %c18 = arith.constant 18 : index
    %17 = vector.load %arg2[%c0_23, %c0_24, %c0_25, %c0_26, %c18] : memref<1x1x1x4x432xf32, #tpu.memory_space<vmem>>, vector<1x1x1x4x384xf32>
    %18 = vector.shape_cast %17 : vector<1x1x1x4x384xf32> to vector<4x384xf32>
    %c3 = arith.constant 3 : index
    %c0_27 = arith.constant 0 : index
    %c0_28 = arith.constant 0 : index
    %19 = vector.load %arg3[%c3, %c0_27, %c0_28] : memref<9x8x4xf32, #tpu.memory_space<vmem>>, vector<1x8x4xf32>
    %20 = vector.shape_cast %19 : vector<1x8x4xf32> to vector<8x4xf32>
    %cst_29 = arith.constant dense<0.000000e+00> : vector<8x384xf32>
    %21 = tpu.matmul %20, %18, %cst_29 {dimension_numbers = #tpu.dot_dimension_numbers<[1], [0], [0], [1], [0, 0, 1, 1], [], []>} : vector<8x4xf32>, vector<4x384xf32>, vector<8x384xf32> -> vector<8x384xf32>
    %22 = arith.addf %16, %21 : vector<8x384xf32>
    %c0_30 = arith.constant 0 : index
    %c0_31 = arith.constant 0 : index
    %c0_32 = arith.constant 0 : index
    %c0_33 = arith.constant 0 : index
    %c19 = arith.constant 19 : index
    %23 = vector.load %arg2[%c0_30, %c0_31, %c0_32, %c0_33, %c19] : memref<1x1x1x4x432xf32, #tpu.memory_space<vmem>>, vector<1x1x1x4x384xf32>
    %24 = vector.shape_cast %23 : vector<1x1x1x4x384xf32> to vector<4x384xf32>
    %c4 = arith.constant 4 : index
    %c0_34 = arith.constant 0 : index
    %c0_35 = arith.constant 0 : index
    %25 = vector.load %arg3[%c4, %c0_34, %c0_35] : memref<9x8x4xf32, #tpu.memory_space<vmem>>, vector<1x8x4xf32>
    %26 = vector.shape_cast %25 : vector<1x8x4xf32> to vector<8x4xf32>
    %cst_36 = arith.constant dense<0.000000e+00> : vector<8x384xf32>
    %27 = tpu.matmul %26, %24, %cst_36 {dimension_numbers = #tpu.dot_dimension_numbers<[1], [0], [0], [1], [0, 0, 1, 1], [], []>} : vector<8x4xf32>, vector<4x384xf32>, vector<8x384xf32> -> vector<8x384xf32>
    %28 = arith.addf %22, %27 : vector<8x384xf32>
    %c0_37 = arith.constant 0 : index
    %c0_38 = arith.constant 0 : index
    %c0_39 = arith.constant 0 : index
    %c0_40 = arith.constant 0 : index
    %c20 = arith.constant 20 : index
    %29 = vector.load %arg2[%c0_37, %c0_38, %c0_39, %c0_40, %c20] : memref<1x1x1x4x432xf32, #tpu.memory_space<vmem>>, vector<1x1x1x4x384xf32>
    %30 = vector.shape_cast %29 : vector<1x1x1x4x384xf32> to vector<4x384xf32>
    %c5 = arith.constant 5 : index
    %c0_41 = arith.constant 0 : index
    %c0_42 = arith.constant 0 : index
    %31 = vector.load %arg3[%c5, %c0_41, %c0_42] : memref<9x8x4xf32, #tpu.memory_space<vmem>>, vector<1x8x4xf32>
    %32 = vector.shape_cast %31 : vector<1x8x4xf32> to vector<8x4xf32>
    %cst_43 = arith.constant dense<0.000000e+00> : vector<8x384xf32>
    %33 = tpu.matmul %32, %30, %cst_43 {dimension_numbers = #tpu.dot_dimension_numbers<[1], [0], [0], [1], [0, 0, 1, 1], [], []>} : vector<8x4xf32>, vector<4x384xf32>, vector<8x384xf32> -> vector<8x384xf32>
    %34 = arith.addf %28, %33 : vector<8x384xf32>
    %c0_44 = arith.constant 0 : index
    %c0_45 = arith.constant 0 : index
    %c0_46 = arith.constant 0 : index
    %c0_47 = arith.constant 0 : index
    %c36 = arith.constant 36 : index
    %35 = vector.load %arg2[%c0_44, %c0_45, %c0_46, %c0_47, %c36] : memref<1x1x1x4x432xf32, #tpu.memory_space<vmem>>, vector<1x1x1x4x384xf32>
    %36 = vector.shape_cast %35 : vector<1x1x1x4x384xf32> to vector<4x384xf32>
    %c6 = arith.constant 6 : index
    %c0_48 = arith.constant 0 : index
    %c0_49 = arith.constant 0 : index
    %37 = vector.load %arg3[%c6, %c0_48, %c0_49] : memref<9x8x4xf32, #tpu.memory_space<vmem>>, vector<1x8x4xf32>
    %38 = vector.shape_cast %37 : vector<1x8x4xf32> to vector<8x4xf32>
    %cst_50 = arith.constant dense<0.000000e+00> : vector<8x384xf32>
    %39 = tpu.matmul %38, %36, %cst_50 {dimension_numbers = #tpu.dot_dimension_numbers<[1], [0], [0], [1], [0, 0, 1, 1], [], []>} : vector<8x4xf32>, vector<4x384xf32>, vector<8x384xf32> -> vector<8x384xf32>
    %40 = arith.addf %34, %39 : vector<8x384xf32>
    %c0_51 = arith.constant 0 : index
    %c0_52 = arith.constant 0 : index
    %c0_53 = arith.constant 0 : index
    %c0_54 = arith.constant 0 : index
    %c37 = arith.constant 37 : index
    %41 = vector.load %arg2[%c0_51, %c0_52, %c0_53, %c0_54, %c37] : memref<1x1x1x4x432xf32, #tpu.memory_space<vmem>>, vector<1x1x1x4x384xf32>
    %42 = vector.shape_cast %41 : vector<1x1x1x4x384xf32> to vector<4x384xf32>
    %c7 = arith.constant 7 : index
    %c0_55 = arith.constant 0 : index
    %c0_56 = arith.constant 0 : index
    %43 = vector.load %arg3[%c7, %c0_55, %c0_56] : memref<9x8x4xf32, #tpu.memory_space<vmem>>, vector<1x8x4xf32>
    %44 = vector.shape_cast %43 : vector<1x8x4xf32> to vector<8x4xf32>
    %cst_57 = arith.constant dense<0.000000e+00> : vector<8x384xf32>
    %45 = tpu.matmul %44, %42, %cst_57 {dimension_numbers = #tpu.dot_dimension_numbers<[1], [0], [0], [1], [0, 0, 1, 1], [], []>} : vector<8x4xf32>, vector<4x384xf32>, vector<8x384xf32> -> vector<8x384xf32>
    %46 = arith.addf %40, %45 : vector<8x384xf32>
    %c0_58 = arith.constant 0 : index
    %c0_59 = arith.constant 0 : index
    %c0_60 = arith.constant 0 : index
    %c0_61 = arith.constant 0 : index
    %c38 = arith.constant 38 : index
    %47 = vector.load %arg2[%c0_58, %c0_59, %c0_60, %c0_61, %c38] : memref<1x1x1x4x432xf32, #tpu.memory_space<vmem>>, vector<1x1x1x4x384xf32>
    %48 = vector.shape_cast %47 : vector<1x1x1x4x384xf32> to vector<4x384xf32>
    %c8 = arith.constant 8 : index
    %c0_62 = arith.constant 0 : index
    %c0_63 = arith.constant 0 : index
    %49 = vector.load %arg3[%c8, %c0_62, %c0_63] : memref<9x8x4xf32, #tpu.memory_space<vmem>>, vector<1x8x4xf32>
    %50 = vector.shape_cast %49 : vector<1x8x4xf32> to vector<8x4xf32>
    %cst_64 = arith.constant dense<0.000000e+00> : vector<8x384xf32>
    %51 = tpu.matmul %50, %48, %cst_64 {dimension_numbers = #tpu.dot_dimension_numbers<[1], [0], [0], [1], [0, 0, 1, 1], [], []>} : vector<8x4xf32>, vector<4x384xf32>, vector<8x384xf32> -> vector<8x384xf32>
    %52 = arith.addf %46, %51 : vector<8x384xf32>
    %cst_65 = arith.constant 0.000000e+00 : f32
    %53 = vector.broadcast %cst_65 : f32 to vector<8x384xf32>
    %54 = arith.maximumf %52, %53 : vector<8x384xf32>
    %c0_66 = arith.constant 0 : index
    %c0_67 = arith.constant 0 : index
    %c0_68 = arith.constant 0 : index
    %55 = vector.load %arg4[%c0_66, %c0_67, %c0_68] : memref<1x8x384xf32, #tpu.memory_space<vmem>>, vector<1x8x384xf32>
    %56 = vector.shape_cast %55 : vector<1x8x384xf32> to vector<8x384xf32>
    %57 = vector.shape_cast %54 : vector<8x384xf32> to vector<1x8x384xf32>
    tpu.vector_store %arg4[%c0_66, %c0_67, %c0_68], %57 {strides = array<i32>} : memref<1x8x384xf32, #tpu.memory_space<vmem>>, vector<1x8x384xf32>,
    return
  }
  func.func @transform_0(%arg0: i32, %arg1: i32) -> (i32, i32, i32, i32, i32) {
    %c0_i32 = arith.constant 0 : i32
    %c0_i32_0 = arith.constant 0 : i32
    %c0_i32_1 = arith.constant 0 : i32
    %c0_i32_2 = arith.constant 0 : i32
    return %arg0, %arg1, %c0_i32, %c0_i32_0, %c0_i32_1 : i32, i32, i32, i32, i32
  }
  func.func @transform_1(%arg0: i32, %arg1: i32) -> (i32, i32, i32) {
    %c0_i32 = arith.constant 0 : i32
    %c0_i32_0 = arith.constant 0 : i32
    %c0_i32_1 = arith.constant 0 : i32
    %c0_i32_2 = arith.constant 0 : i32
    return %c0_i32, %c0_i32_0, %c0_i32_1 : i32, i32, i32
  }
  func.func @transform_2(%arg0: i32, %arg1: i32) -> (i32, i32, i32) {
    %c0_i32 = arith.constant 0 : i32
    %c0_i32_0 = arith.constant 0 : i32
    return %arg0, %c0_i32, %arg1 : i32, i32, i32
  }
}

</mosaic_0001>

<bundles_post_ra>
// kernel: tpu_custom_call.1
= control target key start
LH: loop header
LB: loop body
LE: loop exit
PB: predicated region body
PF: predicated region fallthrough
CT: control target
= control target key end

     0   :  { %7 = vsyncpa [#allocation3], 0  ;;  %s2384_s0 = inlined_call_operand.vmem [shape: f32[2,1,1,4,432], index: 0, kind: input, shape index: {}]   ;;  %s2385_s1 = inlined_call_operand.vmem [shape: f32[9,8,4], index: 1, kind: input, shape index: {}]   ;;  %s2386_s2 = inlined_call_operand.hbm [shape: f32[2,8,384], index: 2, kind: output, shape index: {}]  }
   0x1   :  { %9 = vsyncpa [#allocation3 + $0x1], 0  ;;  %s2143_s9 = smov 0   ;;  %s2145_s10 = smov 0  }
   0x2   :  { %s2147_s11 = smov 0   ;;  %s2149_s12 = smov 0  }
   0x3   :  { %s2151_s13 = smov 0   ;;  %s2153_s14 = smov 0  }
   0x4 LB: > { %s1809_s15 = sadd.s32 4294967295, %s2115_s14   ;;  %s1810_s16 = sadd.s32 4294967294, %s2115_s14   ;;  %s2115_s14 = sphi %s2153_s14, %s15_s14   ;;  %s2111_s13 = sphi %s2151_s13, %s2393_s13   ;;  %s2107_s12 = sphi %s2149_s12, %s2392_s12   ;;  %s2103_s11 = sphi %s2147_s11, %s2391_s11   ;;  %s2099_s10 = sphi %s2145_s10, %s2390_s10   ;;  %s2095_s9 = sphi %s2143_s9, %s2389_s9  }
   0x5   : > { %s27_s17 = sadd.s32 1, %s2111_s13  ;;  %s85_s18 = sadd.s32 1, %s2103_s11 }
   0x6   : > { %p29_p0 = scmp.ge.s32.totalorder %s27_s17, 2  ;;  %p95_p1 = scmp.ne.s32.totalorder %s2103_s11, %s2099_s10 }
   0x7   : > { %p96_p2 = scmp.eq.s32.totalorder %s1809_s15, 1  ;;  %p101_p3 = scmp.ne.s32.totalorder %s2099_s10, %s2095_s9 }
   0x8   : > { %s2395_s17 = smov (%p29_p0, %s27_s17), 0  ;;  %p102_p5 = scmp.eq.s32.totalorder %s1810_s16, 1 }
   0x9   : > { %p2183_p4 = por %p96_p2, %p95_p1  ;;  %s80_s20 = ssub.s32 %s2111_s13, %s2395_s17 }
   0xa   : > { %p1813_p6 = scmp.ge.s32.totalorder %s2115_s14, 1  ;;  %p83_p7 = scmp.eq.s32.totalorder %s80_s20, 0 }
   0xb   : > { %p2190_p8 = por %p102_p5, %p101_p3  ;;  %p135_p9 = scmp.lt.s32.totalorder %s2115_s14, 3 }
   0xc   : > { %s2196_s22 = scalar_select %p83_p7, %s2103_s11, %s85_s18  }
   0xd   : > { %p136_p10 = pnand %p1813_p6, %p135_p9 }
   0xe   : > { %p161_p11 = scmp.lt.s32.totalorder (!%p136_p10), %s2107_s12, 1  ;;  %v2117_v0 = vmov (!%p136_p10), 0.0   ;;  %vm2118_vm0 = vmmov (!%p136_p10), 0   ;;  %s2119_s28 = smov (!%p136_p10), 127   ;;  %vm189_vm1 = vcmask (!%p136_p10), 1039360   ;;  %vm197_vm2 = vcmask (!%p136_p10), 1043456  }
   0xf   : > { %139 = sbr.rel (%p136_p10) target bundleno = 444 (0x1bc), region = 28  ;;  %1891 = vmatprep.subr.mxu1 (!%p136_p10), %v2117_v0  ;;  %1893 = vmatprep.mubr.msk.f32.mxu1 (!%p136_p10), %vm2118_vm0, %v2117_v0  ;;  %s2120_s29 = smov (!%p136_p10), 126   ;;  %v1816_v9 = vld [vmem:[%s2385_s1 + $0x8] sm:$0xff] (!%p136_p10)  ;;  %vm193_vm3 = vcmask (!%p136_p10), 31744   ;;  %vm512_vm4 = vcmask (!%p136_p10), 1031168   ;;  %v173_v19 = vld [vmem:[%s2385_s1] sm:$0xff] (!%p136_p10) }
  0x10   : > { %268 = vmatprep.mubr.f32.mxu0 (!%p136_p10), %v2117_v0  ;;  %s2121_s30 = smov (!%p136_p10), 110   ;;  %s2122_s3 = smov (!%p136_p10), 109   ;;  %vm685_vm5 = vcmask (!%p136_p10), 900096   ;;  %v1827_v27 = vld [vmem:[%s2385_s1 + $0x10] sm:$0xff] (!%p136_p10)  ;;  %vm858_vm6 = vcmask (!%p136_p10), 891904   ;;  %v1833_v35 = vld [vmem:[%s2385_s1 + $0x18] sm:$0xff] (!%p136_p10) }
  0x11   : > { %s2123_s4 = smov (!%p136_p10), 108   ;;  %s2124_s5 = smov (!%p136_p10), 92   ;;  %vm1031_vm7 = vcmask (!%p136_p10), 883712   ;;  %v1839_v43 = vld [vmem:[%s2385_s1 + $0x20] sm:$0xff] (!%p136_p10)  ;;  %vm1204_vm8 = vcmask (!%p136_p10), 752640   ;;  %v1845_v51 = vld [vmem:[%s2385_s1 + $0x28] sm:$0xff] (!%p136_p10) }
  0x12   : > { %s2125_s6 = smov (!%p136_p10), 91   ;;  %s2126_s7 = smov (!%p136_p10), 90   ;;  %vm1377_vm9 = vcmask (!%p136_p10), 744448   ;;  %v1851_v59 = vld [vmem:[%s2385_s1 + $0x30] sm:$0xff] (!%p136_p10)  ;;  %vm1550_vm10 = vcmask (!%p136_p10), 736256  }
  0x13   : > { %s158_s8 = sand.u32 (!%p136_p10), 1, %s2099_s10   ;;  %s1969_s16 = smul.u32 (!%p136_p10), 384, %s2107_s12 }
  0x14   : > { %s1968_s15 = smul.u32 (!%p136_p10), 24, %s158_s8 }
  0x15   : > { %s2337_s25 = scalar_lea.hbm (!%p136_p10), %s2386_s2, %s1969_s16 }
  0x16   : > { %s162_s23 = scalar_select %p161_p11, %s2107_s12, 1 }
  0x17   : > { %s160_s18 = scalar_lea.vmem [#allocation2], %s1968_s15  ;;  %s1714_s12 = scalar_lea.sflag [#allocation3], %s158_s8 }
  0x18   : > { %s1872_s24 = sshll.u32 %s162_s23, 4  ;;  %s1730_s20 = sshll.u32 %s160_s18, 4  ;;  %s2339_s20 = int_to_ptr.vmem [resolvable:$true] %s1730_s20 }
  0x19   : > { %s2207_s27 = scalar_lea.vmem %s2384_s0, %s1872_s24  ;;  %s2037_s26 = scalar_lea.vmem %s2339_s20, 384 }
  0x1a   : > { %v2210_v1 = vld [vmem:[%s2207_s27] sm:$0xff]  ;;  %v174_v2 = vld [vmem:[%s2207_s27 + $0x8] sm:$0xff]  ;;  %p2038_p12 = scmp.ne.s32.totalorder %s2339_s20, %s2037_s26 }
  0x1b   : > { %181 = vrot.lane.b32.xlu1 %v2210_v1, %s2119_s28  ;;  %v179_v3 = vcombine.high %v2210_v1, %v2210_v1  ;;  %v180_v4 = vcombine.high %v174_v2, %v174_v2  ;;  %v172_v14 = vld [vmem:[%s2207_s27 + $0x8] sm:$0xf]  ;;  %s2127_s27 = smov [#allocation2]  }
  0x1c   : > { %p2039_p13 = pnand %p2038_p12, %p2183_p4 }
  0x1d   : > { %183 = vrot.lane.b32.xlu0 %v179_v3, %s2119_s28 }
  0x1e   : > { %p2040_p0 = pneg %p2039_p13 }
  0x1f   : > { %187 = vrot.lane.b32.xlu1 %v180_v4, %s2119_s28 }
  0x21   : > { %185 = vrot.lane.b32.xlu0 %v174_v2, %s2119_s28  ;;  %s2041_s28 = sshll.u32 %s2127_s27, 4  ;;  %s2042_s28 = int_to_ptr.vmem [resolvable:$false] %s2041_s28 }
  0x22   : > { %p2044_p1 = scmp.lt.s32.totalorder %s2339_s20, %s2042_s28 }
  0x23   : > { %508 = vrot.lane.b32.xlu1 %v174_v2, %s2120_s29 }
  0x25   : > { %506 = vrot.lane.b32.xlu0 %v179_v3, %s2120_s29 }
  0x27   : > { %510 = vrot.lane.b32.xlu1 %v180_v4, %s2120_s29 }
  0x29   : > { %504 = vrot.lane.b32.xlu0 %v2210_v1, %s2120_s29  ;;  %s2043_s29 = scalar_lea.vmem %s2042_s28, 768 }
  0x2a   : > { %p2045_p2 = scmp.lt.s32.totalorder %s2043_s29, %s2037_s26 }
  0x2b   : > { %681 = vrot.lane.b32.xlu1 %v174_v2, %s2121_s30 }
  0x2c   : > { %p2046_p3 = por %p2045_p2, %p2044_p1 }
  0x2d   : > { %679 = vrot.lane.b32.xlu0 %v179_v3, %s2121_s30 }
  0x2e   : > { %p2047_p5 = pnand %p2046_p3, %p2040_p0 }
  0x2f   : > { %683 = vrot.lane.b32.xlu1 %v180_v4, %s2121_s30 }
  0x31   : > { %677 = vrot.lane.b32.xlu0 %v2210_v1, %s2121_s30 }
  0x33   : > { %854 = vrot.lane.b32.xlu1 %v174_v2, %s2122_s3 }
  0x35   : > { %852 = vrot.lane.b32.xlu0 %v179_v3, %s2122_s3 }
  0x37   : > { %856 = vrot.lane.b32.xlu1 %v180_v4, %s2122_s3 }
  0x39   : > { %850 = vrot.lane.b32.xlu0 %v2210_v1, %s2122_s3 }
  0x3b   : > { %1027 = vrot.lane.b32.xlu1 %v174_v2, %s2123_s4 }
  0x3d   : > { %1025 = vrot.lane.b32.xlu0 %v179_v3, %s2123_s4 }
  0x3f   : > { %1029 = vrot.lane.b32.xlu1 %v180_v4, %s2123_s4 }
  0x41   : > { %1023 = vrot.lane.b32.xlu0 %v2210_v1, %s2123_s4 }
  0x43   : > { %1200 = vrot.lane.b32.xlu1 %v174_v2, %s2124_s5 }
  0x45   : > { %1198 = vrot.lane.b32.xlu0 %v179_v3, %s2124_s5 }
  0x47   : > { %1202 = vrot.lane.b32.xlu1 %v180_v4, %s2124_s5 }
  0x49   : > { %1196 = vrot.lane.b32.xlu0 %v2210_v1, %s2124_s5 }
  0x4b   : > { %1373 = vrot.lane.b32.xlu1 %v174_v2, %s2125_s6 }
  0x4d   : > { %1371 = vrot.lane.b32.xlu0 %v179_v3, %s2125_s6 }
  0x4f   : > { %1375 = vrot.lane.b32.xlu1 %v180_v4, %s2125_s6 }
  0x51   : > { %1369 = vrot.lane.b32.xlu0 %v2210_v1, %s2125_s6 }
  0x53   : > { %1546 = vrot.lane.b32.xlu1 %v174_v2, %s2126_s7 }
  0x55   : > { %1544 = vrot.lane.b32.xlu0 %v179_v3, %s2126_s7 }
  0x57   : > { %1548 = vrot.lane.b32.xlu1 %v180_v4, %s2126_s7  ;;  %v1857_v4 = vld [vmem:[%s2385_s1 + $0x38] sm:$0xff] }
  0x59   : > { %1542 = vrot.lane.b32.xlu0 %v2210_v1, %s2126_s7 }
  0x8d   : > { %v182_v5 = vpop.permute.xlu1 %181 }
  0x8f   : > { %v184_v6 = vpop.permute.xlu0 %183 }
  0x90   : > { %v190_v12 = vsel %vm189_vm1, %v182_v5, %v184_v6 }
  0x91   : > { %v188_v7 = vpop.permute.xlu1 %187 }
  0x93   : > { %v186_v8 = vpop.permute.xlu0 %185 }
  0x94   : > { %v191_v10 = vsel %vm189_vm1, %v184_v6, %v186_v8  ;;  %v192_v11 = vsel %vm189_vm1, %v186_v8, %v188_v7  ;;  %v1863_v7 = vld [vmem:[%s2385_s1 + $0x40] sm:$0xff] }
  0x95   : > { %1817 = vmatprep.subr.msk.mxu0 %vm197_vm2, %v191_v10  ;;  %1892 = vmatpush3.msk.msra.mxu1 %vm197_vm2, %v192_v11  ;;  %v509_v13 = vpop.permute.xlu1 %508 }
  0x96   : > { %1818 = vmatpush1.msk.msra.mxu0 %vm197_vm2, %v190_v12  ;;  %1894 = vmatmul.mubr.msk.f32.vlgmr.msra.gmra.mrb[0].mxu1 %vm193_vm3, %v1816_v9 }
  0x97   : > { %1819 = vmatmul.mubr.msk.f32.vlgmr.msra.gmra.mrb[0].mxu0 %vm193_vm3, %v1816_v9  ;;  %1822 = vmatprep.subr.msk.mxu0 %vm197_vm2, %v179_v3  ;;  %v507_v15 = vpop.permute.xlu0 %506 }
  0x98   : > { %v514_v16 = vsel %vm512_vm4, %v507_v15, %v509_v13  ;;  %1823 = vmatpush1.msk.msra.mxu0 %vm197_vm2, %v2210_v1  ;;  %1896 = vmatprep.subr.mxu1 %v2117_v0 }
  0x99   : > { %1897 = vmatpush3.msk.msra.mxu1 %vm197_vm2, %v172_v14  ;;  %v511_v17 = vpop.permute.xlu1 %510  ;;  %1828 = vmatprep.subr.msk.mxu0 %vm197_vm2, %v514_v16 }
  0x9a   : > { %1898 = vmatprep.mubr.msk.f32.mxu1 %vm2118_vm0, %v2117_v0  ;;  %1901 = vmatprep.subr.mxu1 %v2117_v0  ;;  %v515_v20 = vsel %vm512_vm4, %v509_v13, %v511_v17 }
  0x9b   : > { %v505_v18 = vpop.permute.xlu0 %504  ;;  %419 = vmatprep.mubr.f32.mxu0 %v2117_v0 }
  0x9c   : > { %v513_v21 = vsel %vm512_vm4, %v505_v18, %v507_v15 }
  0x9d   : > { %v682_v22 = vpop.permute.xlu1 %681 }
  0x9e   : > { %1899 = vmatmul.mubr.msk.f32.vlgmr.msra.gmra.mrb[0].mxu1 %vm193_vm3, %v173_v19 }
  0x9f   : > { %1902 = vmatpush3.msk.msra.mxu1 %vm197_vm2, %v515_v20  ;;  %1824 = vmatmul.mubr.msk.f32.vlgmr.msra.gmra.mrb[0].mxu0 %vm193_vm3, %v173_v19  ;;  %v680_v23 = vpop.permute.xlu0 %679 }
  0xa0   : > { %1829 = vmatpush1.msk.msra.mxu0 %vm197_vm2, %v513_v21  ;;  %v687_v24 = vsel %vm685_vm5, %v680_v23, %v682_v22  ;;  %1903 = vmatprep.mubr.msk.f32.mxu1 %vm2118_vm0, %v2117_v0 }
  0xa1   : > { %v684_v25 = vpop.permute.xlu1 %683  ;;  %1834 = vmatprep.subr.msk.mxu0 %vm197_vm2, %v687_v24  ;;  %1906 = vmatprep.subr.mxu1 %v2117_v0 }
  0xa2   : > { %589 = vmatprep.mubr.f32.mxu0 %v2117_v0  ;;  %v688_v28 = vsel %vm685_vm5, %v682_v22, %v684_v25 }
  0xa3   : > { %v678_v26 = vpop.permute.xlu0 %677 }
  0xa4   : > { %v686_v29 = vsel %vm685_vm5, %v678_v26, %v680_v23 }
  0xa5   : > { %v855_v30 = vpop.permute.xlu1 %854 }
  0xa6   : > { %1904 = vmatmul.mubr.msk.f32.vlgmr.msra.gmra.mrb[0].mxu1 %vm193_vm3, %v1827_v27 }
  0xa7   : > { %1907 = vmatpush3.msk.msra.mxu1 %vm197_vm2, %v688_v28  ;;  %1830 = vmatmul.mubr.msk.f32.vlgmr.msra.gmra.mrb[0].mxu0 %vm193_vm3, %v1827_v27  ;;  %v853_v31 = vpop.permute.xlu0 %852 }
  0xa8   : > { %1835 = vmatpush1.msk.msra.mxu0 %vm197_vm2, %v686_v29  ;;  %v860_v32 = vsel %vm858_vm6, %v853_v31, %v855_v30  ;;  %1908 = vmatprep.mubr.msk.f32.mxu1 %vm2118_vm0, %v2117_v0 }
  0xa9   : > { %v857_v33 = vpop.permute.xlu1 %856  ;;  %1840 = vmatprep.subr.msk.mxu0 %vm197_vm2, %v860_v32  ;;  %1911 = vmatprep.subr.mxu1 %v2117_v0 }
  0xaa   : > { %762 = vmatprep.mubr.f32.mxu0 %v2117_v0  ;;  %v861_v36 = vsel %vm858_vm6, %v855_v30, %v857_v33 }
  0xab   : > { %v851_v34 = vpop.permute.xlu0 %850 }
  0xac   : > { %v859_v37 = vsel %vm858_vm6, %v851_v34, %v853_v31 }
  0xad   : > { %v1028_v38 = vpop.permute.xlu1 %1027 }
  0xae   : > { %1909 = vmatmul.mubr.msk.f32.vlgmr.msra.gmra.mrb[0].mxu1 %vm193_vm3, %v1833_v35 }
  0xaf   : > { %1912 = vmatpush3.msk.msra.mxu1 %vm197_vm2, %v861_v36  ;;  %1836 = vmatmul.mubr.msk.f32.vlgmr.msra.gmra.mrb[0].mxu0 %vm193_vm3, %v1833_v35  ;;  %v1026_v39 = vpop.permute.xlu0 %1025 }
  0xb0   : > { %1841 = vmatpush1.msk.msra.mxu0 %vm197_vm2, %v859_v37  ;;  %v1033_v40 = vsel %vm1031_vm7, %v1026_v39, %v1028_v38  ;;  %1913 = vmatprep.mubr.msk.f32.mxu1 %vm2118_vm0, %v2117_v0 }
  0xb1   : > { %v1030_v41 = vpop.permute.xlu1 %1029  ;;  %1846 = vmatprep.subr.msk.mxu0 %vm197_vm2, %v1033_v40  ;;  %1916 = vmatprep.subr.mxu1 %v2117_v0 }
  0xb2   : > { %935 = vmatprep.mubr.f32.mxu0 %v2117_v0  ;;  %v1034_v44 = vsel %vm1031_vm7, %v1028_v38, %v1030_v41 }
  0xb3   : > { %v1024_v42 = vpop.permute.xlu0 %1023 }
  0xb4   : > { %v1032_v45 = vsel %vm1031_vm7, %v1024_v42, %v1026_v39 }
  0xb5   : > { %v1201_v46 = vpop.permute.xlu1 %1200 }
  0xb6   : > { %1914 = vmatmul.mubr.msk.f32.vlgmr.msra.gmra.mrb[0].mxu1 %vm193_vm3, %v1839_v43 }
  0xb7   : > { %1917 = vmatpush3.msk.msra.mxu1 %vm197_vm2, %v1034_v44  ;;  %1842 = vmatmul.mubr.msk.f32.vlgmr.msra.gmra.mrb[0].mxu0 %vm193_vm3, %v1839_v43  ;;  %v1199_v47 = vpop.permute.xlu0 %1198 }
  0xb8   : > { %1847 = vmatpush1.msk.msra.mxu0 %vm197_vm2, %v1032_v45  ;;  %v1206_v48 = vsel %vm1204_vm8, %v1199_v47, %v1201_v46  ;;  %1918 = vmatprep.mubr.msk.f32.mxu1 %vm2118_vm0, %v2117_v0 }
  0xb9   : > { %v1203_v49 = vpop.permute.xlu1 %1202  ;;  %1852 = vmatprep.subr.msk.mxu0 %vm197_vm2, %v1206_v48  ;;  %1921 = vmatprep.subr.mxu1 %v2117_v0 }
  0xba   : > { %1108 = vmatprep.mubr.f32.mxu0 %v2117_v0  ;;  %v1207_v52 = vsel %vm1204_vm8, %v1201_v46, %v1203_v49 }
  0xbb   : > { %v1197_v50 = vpop.permute.xlu0 %1196 }
  0xbc   : > { %v1205_v53 = vsel %vm1204_vm8, %v1197_v50, %v1199_v47 }
  0xbd   : > { %v1374_v54 = vpop.permute.xlu1 %1373 }
  0xbe   : > { %1919 = vmatmul.mubr.msk.f32.vlgmr.msra.gmra.mrb[0].mxu1 %vm193_vm3, %v1845_v51 }
  0xbf   : > { %1922 = vmatpush3.msk.msra.mxu1 %vm197_vm2, %v1207_v52  ;;  %1848 = vmatmul.mubr.msk.f32.vlgmr.msra.gmra.mrb[0].mxu0 %vm193_vm3, %v1845_v51  ;;  %v1372_v55 = vpop.permute.xlu0 %1371 }
  0xc0   : > { %1853 = vmatpush1.msk.msra.mxu0 %vm197_vm2, %v1205_v53  ;;  %v1379_v56 = vsel %vm1377_vm9, %v1372_v55, %v1374_v54  ;;  %1923 = vmatprep.mubr.msk.f32.mxu1 %vm2118_vm0, %v2117_v0 }
  0xc1   : > { %v1376_v57 = vpop.permute.xlu1 %1375  ;;  %1858 = vmatprep.subr.msk.mxu0 %vm197_vm2, %v1379_v56  ;;  %1926 = vmatprep.subr.mxu1 %v2117_v0 }
  0xc2   : > { %1281 = vmatprep.mubr.f32.mxu0 %v2117_v0  ;;  %v1380_v60 = vsel %vm1377_vm9, %v1374_v54, %v1376_v57 }
  0xc3   : > { %v1370_v58 = vpop.permute.xlu0 %1369 }
  0xc4   : > { %v1378_v61 = vsel %vm1377_vm9, %v1370_v58, %v1372_v55 }
  0xc5   : > { %v1547_v62 = vpop.permute.xlu1 %1546 }
  0xc6   : > { %1924 = vmatmul.mubr.msk.f32.vlgmr.msra.gmra.mrb[0].mxu1 %vm193_vm3, %v1851_v59 }
  0xc7   : > { %1927 = vmatpush3.msk.msra.mxu1 %vm197_vm2, %v1380_v60  ;;  %1854 = vmatmul.mubr.msk.f32.vlgmr.msra.gmra.mrb[0].mxu0 %vm193_vm3, %v1851_v59  ;;  %v1545_v63 = vpop.permute.xlu0 %1544 }
  0xc8   : > { %1859 = vmatpush1.msk.msra.mxu0 %vm197_vm2, %v1378_v61  ;;  %v1552_v1 = vsel %vm1550_vm10, %v1545_v63, %v1547_v62  ;;  %1928 = vmatprep.mubr.msk.f32.mxu1 %vm2118_vm0, %v2117_v0 }
  0xc9   : > { %v1549_v2 = vpop.permute.xlu1 %1548  ;;  %1864 = vmatprep.subr.msk.mxu0 %vm197_vm2, %v1552_v1  ;;  %1931 = vmatprep.subr.mxu1 %v2117_v0 }
  0xca   : > { %1454 = vmatprep.mubr.f32.mxu0 %v2117_v0  ;;  %v1553_v5 = vsel %vm1550_vm10, %v1547_v62, %v1549_v2 }
  0xcb   : > { %v1543_v3 = vpop.permute.xlu0 %1542 }
  0xcc   : > { %v1551_v6 = vsel %vm1550_vm10, %v1543_v3, %v1545_v63 }
  0xce   : > { %1929 = vmatmul.mubr.msk.f32.vlgmr.msra.gmra.mrb[0].mxu1 %vm193_vm3, %v1857_v4 }
  0xcf   : > { %1932 = vmatpush3.msk.msra.mxu1 %vm197_vm2, %v1553_v5  ;;  %1860 = vmatmul.mubr.msk.f32.vlgmr.msra.gmra.mrb[0].mxu0 %vm193_vm3, %v1857_v4 }
  0xd0   : > { %1865 = vmatpush1.msk.msra.mxu0 %vm197_vm2, %v1551_v6  ;;  %1933 = vmatprep.mubr.msk.f32.mxu1 %vm2118_vm0, %v2117_v0 }
  0xd1   : > { %1627 = vmatprep.mubr.f32.mxu0 %v2117_v0 }
  0xd6   : > { %1934 = vmatmul.mubr.msk.f32.vlgmr.msra.gmra.mrb[0].mxu1 %vm193_vm3, %v1863_v7 }
  0xd7   : > { %1866 = vmatmul.mubr.msk.f32.vlgmr.msra.gmra.mrb[0].mxu0 %vm193_vm3, %v1863_v7 }
 0x1a9   : > { %v1700_v8 = vpop.f32.mrb[0].mxu1 }
 0x1aa   : > { %v1709_v9 = vmax.f32 %v1700_v8, 0.0  ;;  %v1629_v10 = vpop.f32.mrb[0].mxu0  ;;  %v1935_v11 = vpop.f32.mrb[1].mxu1 }
 0x1ab   : > { %v1707_v12 = vmax.f32 %v1629_v10, 0.0  ;;  %v1631_v0 = vpop.f32.mrb[1].mxu0 }
 0x1ac   : > { %1712 = vst [vmem:[%s160_s18 + $0x10] sm:$0xff] %v1709_v9  ;;  %v1708_v13 = vmax.f32 %v1631_v0, 0.0 }
 0x1ad   : > { %1710 = vst [vmem:[%s160_s18] sm:$0xff] %v1707_v12 }
 0x1ae   : > { %1711 = vst [vmem:[%s160_s18 + $0x8] sm:$0xff] %v1708_v13 }
 0x1af   : > { %2050 = shalt.err (!%p2047_p5)
}
 0x1b0   : > { %s2051_s30 = scalar_lea.hbm %s2337_s25, 384  ;;  %s2055_s5 = scalar_lea.hbm %s2386_s2, 768 }
 0x1b1   : > { %p2052_p6 = scmp.ne.s32.totalorder %s2337_s25, %s2051_s30  ;;  %p2056_p10 = scmp.lt.u32.totalorder %s2337_s25, %s2386_s2 }
 0x1b2   : > { %p2057_p11 = scmp.lt.u32.totalorder %s2055_s5, %s2051_s30  ;;  %p2059_p13 = scmp.lt.u32.totalorder %s2051_s30, %s2337_s25 }
 0x1b3   : > { %p2053_p7 = pnand %p2052_p6, %p2183_p4 }
 0x1b4   : > { %p2058_p12 = por %p2057_p11, %p2056_p10 }
 0x1b5   : > { %p2054_p9 = pneg %p2053_p7 }
 0x1b6   : > { %p2060_p0 = por %p2059_p13, %p2058_p12 }
 0x1b8   : > { %p2061_p1 = pnand %p2060_p0, %p2054_p9 }
 0x1ba   : > { %2064 = shalt.err (!%p2061_p1)
}
 0x1bb   : > { %1970 = dma.vmem_to_hbm [thread:$0]  (%p2183_p4), %s2339_s20, 384, %s2337_s25, %s1714_s12  }
 0x1bc PF: > { %p1976_p2 = scmp.ge.s32.totalorder %s2115_s14, 2  ;;  %s1742_s8 = sand.u32 1, %s2095_s9  }
 0x1bd   : > { %s1743_s15 = scalar_lea.sflag [#allocation3], %s1742_s8 }
 0x1be   : > { %p1973_p3 = pnand %p1976_p2, %p2190_p8 }
 0x1c0   : > { %2090 = dma.done.wait (!%p1973_p3), %s1743_s15, 384  }
 0x1c1   : > { %2092 = vsyncadd (!%p1973_p3), %s1743_s15, 4294966912  ;;  %s15_s14 = sadd.s32 1, %s2115_s14   ;;  %s2389_s9 = smov %s2099_s10 }
 0x1c2   : > { %p12_p5 = scmp.ge.s32.totalorder %s15_s14, 4   ;;  %s2390_s10 = smov %s2103_s11 }
 0x1c3   : > { %s2391_s11 = smov %s2196_s22  ;;  %s2392_s12 = smov %s2111_s13 }
 0x1c4   : > { %s2393_s13 = smov %s2395_s17  ;;  %14 = sbr.rel (!%p12_p5) target bundleno = 4 (0x4), region = 71 }
 0x1cb   :  { %1748 = vsyncpa [#allocation3], 1 }
 0x1cc   :  { %1750 = vsyncpa [#allocation3 + $0x1], 1 }

</bundles_post_ra>
